<compile_context>
chip_gen: v7x
topology: tpu7x:2x2x1
jax: 0.10.0
libtpu: 0.0.40
codegen_flags: <defaults>
</compile_context>

<pallas_src>
import jax
import jax.numpy as jnp
from jax.experimental import pallas as pl
from jax.experimental.pallas import tpu as pltpu

_LANE = 128
_MAX_TP = 32768  # cap on lanes per block; keeps per-block VMEM use trivial


# -----------------------------------------------------------------------------
# Fused kernel: relu-chain of L pointwise (1x1) convs over one (C, TP) slab.
# -----------------------------------------------------------------------------
def _fused_pw_chain_kernel(x_ref, wt_ref, b_ref, o_ref):
    """
    x_ref : (1, C, TP)   input pixels  (channels on sublanes, pixels on lanes)
    wt_ref: (L, C, C)    wt[l, co, ci] = W_l[ci, co]   (pre-transposed weights)
    b_ref : (L, C, 1)    b[l, co]
    o_ref : (1, C, TP)
    """
    x = x_ref[0]                                   # (C, TP) f32
    n_layers = wt_ref.shape[0]
    n_ch = wt_ref.shape[2]
    for l in range(n_layers):                      # static unroll (L is tiny)
        w = wt_ref[l]                              # (C_out, C_in)
        b = b_ref[l]                               # (C_out, 1)
        # y[co, p] = sum_ci x[ci, p] * W_l[ci, co]   -- VPU broadcast FMAs,
        # output stays lane-dense (TP lanes).
        acc = x[0:1, :] * w[:, 0:1]                # (1,TP) * (C,1) -> (C,TP)
        for ci in range(1, n_ch):
            acc = acc + x[ci:ci + 1, :] * w[:, ci:ci + 1]
        x = jnp.maximum(acc + b, 0.0)              # bias (hoisted) + ReLU
    o_ref[0] = x.astype(o_ref.dtype)


def fused_pointwise_relu_chain(x_bcp, weights, biases):
    """Apply relu(x @ W_l + b_l) for l = 0..L-1 over the channel dim.

    x_bcp  : (B, C, P) float32, channels-second, pixels-last (lane-dense)
    weights: list of (C, C) arrays, applied per pixel as x @ W
    biases : list of (C,) arrays
    returns: (B, C, P) float32
    """
    B, C, P = x_bcp.shape
    L = len(weights)
    assert L == len(biases) and L >= 1
    for w, b in zip(weights, biases):
        assert w.shape == (C, C) and b.shape == (C,), (w.shape, b.shape)

    # Stack + pre-transpose params once (tiny, done by XLA outside the kernel).
    wt = jnp.stack([w.T for w in weights], axis=0).astype(jnp.float32)  # (L,C,C)
    bb = jnp.stack(biases, axis=0).astype(jnp.float32)[..., None]       # (L,C,1)

    # Lane-pad the pixel dim to a multiple of 128 / the block width instead of
    # hard-asserting divisibility.  Padded pixels are sliced off afterwards.
    p128 = pl.cdiv(P, _LANE) * _LANE
    tp = min(p128, _MAX_TP)
    p_pad = pl.cdiv(P, tp) * tp
    x = x_bcp.astype(jnp.float32)
    if p_pad != P:
        x = jnp.pad(x, ((0, 0), (0, 0), (0, p_pad - P)))

    grid = (B, p_pad // tp)
    out = pl.pallas_call(
        _fused_pw_chain_kernel,
        out_shape=jax.ShapeDtypeStruct((B, C, p_pad), jnp.float32),
        grid_spec=pltpu.PrefetchScalarGridSpec(
            num_scalar_prefetch=0,
            grid=grid,
            in_specs=[
                pl.BlockSpec((1, C, tp), lambda ib, ip: (ib, 0, ip)),
                pl.BlockSpec((L, C, C), lambda ib, ip: (0, 0, 0)),  # resident
                pl.BlockSpec((L, C, 1), lambda ib, ip: (0, 0, 0)),  # resident
            ],
            out_specs=pl.BlockSpec((1, C, tp), lambda ib, ip: (ib, 0, ip)),
        ),
        compiler_params=pltpu.CompilerParams(
            # Both grid axes independent -> megacore / v7x dual-TC sharding.
            dimension_semantics=("parallel", "parallel"),
            # Explicit, with headroom (v7x physical VMEM is only 64 MiB).
            vmem_limit_bytes=32 * 1024 * 1024,
        ),
    )(x, wt, bb)

    if p_pad != P:
        out = out[:, :, :P]
    return out


def _apply_chain(feats, weights, biases):
    """Run the fused pointwise-conv+ReLU chain over a list of NCHW features."""
    c_out = weights[-1].shape[1]
    if len({f.shape for f in feats}) == 1:
        # Same-shape features: stack them -> the whole chain is ONE kernel call.
        n, c, h, w = feats[0].shape
        nf = len(feats)
        x = jnp.stack(feats, axis=0).reshape(nf * n, c, h * w)
        y = fused_pointwise_relu_chain(x, weights, biases)
        y = y.reshape(nf, n, c_out, h, w)
        return [y[i] for i in range(nf)]
    # Ragged feature shapes: still fused across layers, one call per feature.
    out = []
    for f in feats:
        n, c, h, w = f.shape
        y = fused_pointwise_relu_chain(f.reshape(n, c, h * w), weights, biases)
        out.append(y.reshape(n, c_out, h, w))
    return out


# -----------------------------------------------------------------------------
# Synthetic sub-block + MySequential-equivalent container.
# -----------------------------------------------------------------------------
class PointwiseConvBlock:
    """1x1 conv (channel matmul) + ReLU on every feature.

    Signature mirrors the sub-modules MySequential chains: module(dataset, *feat).
    """

    def __init__(self, weight, bias):
        self.weight = weight  # (C_in, C_out), applied per pixel as x @ W
        self.bias = bias      # (C_out,)

    def __call__(self, dataset, *feats):
        return _apply_chain(list(feats), [self.weight], [self.bias])


class MySequentialPallas:
    """MySequential equivalent: thread (dataset, feature-list) through modules."""

    def __init__(self, *modules):
        self._modules = list(modules)

    def forward(self, dataset, x, *other_x):
        feat = [x, *other_x]
        # Fast path: a chain of pointwise blocks is fused into ONE Pallas call
        # (all layers x all features); semantics identical to module-by-module.
        if self._modules and all(
            isinstance(m, PointwiseConvBlock) for m in self._modules
        ):
            return _apply_chain(
                feat,
                [m.weight for m in self._modules],
                [m.bias for m in self._modules],
            )
        # Generic fallback: chain arbitrary sub-modules exactly like the spec.
        # TODO(synk): arbitrary third-party sub-modules are not fused here.
        for module in self._modules:
            feat = module(dataset, *feat)
        return feat


if __name__ == "__main__":
    key = jax.random.PRNGKey(0)
    k_x1, k_x2, k_w1, k_b1, k_w2, k_b2 = jax.random.split(key, 6)

    N, C, H, W = 2, 4, 16, 16  # small NCHW features
    x = jax.random.normal(k_x1, (N, C, H, W), dtype=jnp.float32)
    x_extra = jax.random.normal(k_x2, (N, C, H, W), dtype=jnp.float32)

    # Deterministic parameters for two chained pointwise-conv blocks.
    w1 = jax.random.normal(k_w1, (C, C), dtype=jnp.float32) * 0.1
    b1 = jax.random.normal(k_b1, (C,), dtype=jnp.float32) * 0.1
    w2 = jax.random.normal(k_w2, (C, C), dtype=jnp.float32) * 0.1
    b2 = jax.random.normal(k_b2, (C,), dtype=jnp.float32) * 0.1

    model = MySequentialPallas(
        PointwiseConvBlock(w1, b1),
        PointwiseConvBlock(w2, b2),
    )

    feats = model.forward("cityscapes", x, x_extra)
    feats = [jax.block_until_ready(f) for f in feats]

    # Pure-jnp reference of the same chain (per-pixel channel matmul + ReLU).
    def ref_chain(f):
        y = f
        for wgt, bias in ((w1, b1), (w2, b2)):
            y = jnp.einsum("nchw,cd->ndhw", y, wgt) + bias[None, :, None, None]
            y = jnp.maximum(y, 0.0)
        return y

    assert len(feats) == 2
    for f, x_in in zip(feats, (x, x_extra)):
        assert f.shape == (N, C, H, W)
        assert f.dtype == jnp.float32
        ref = ref_chain(x_in)
        assert jnp.allclose(f, ref, atol=1e-5, rtol=1e-5), float(
            jnp.max(jnp.abs(f - ref))
        )

    print("KERNEL_OK")
</pallas_src>

<mosaic_0001>
module attributes {stable_mosaic.version = 11 : i64} {
  func.func @_fused_pw_chain_kernel(%arg0: i32, %arg1: i32, %arg2: memref<1x4x256xf32, #tpu.memory_space<vmem>>, %arg3: memref<2x4x4xf32, #tpu.memory_space<vmem>>, %arg4: memref<2x4x1xf32, #tpu.memory_space<vmem>>, %arg5: memref<1x4x256xf32, #tpu.memory_space<vmem>>) attributes {dimension_semantics = [#tpu.dimension_semantics<parallel>, #tpu.dimension_semantics<parallel>], iteration_bounds = array<i64: 4, 1>, scalar_prefetch = 0 : i64, scratch_operands = 0 : i64, tpu.core_type = #tpu.core_type<tc>, window_params = [{transform_indices = @transform_0, window_bounds = array<i64: 1, 4, 256>}, {pipeline_mode = #tpu.pipeline_mode<synchronous>, transform_indices = @transform_1, window_bounds = array<i64: 2, 4, 4>}, {pipeline_mode = #tpu.pipeline_mode<synchronous>, transform_indices = @transform_2, window_bounds = array<i64: 2, 4, 1>}, {transform_indices = @transform_3, window_bounds = array<i64: 1, 4, 256>}]} {
    %c0 = arith.constant 0 : index
    %c0_0 = arith.constant 0 : index
    %c0_1 = arith.constant 0 : index
    %0 = vector.load %arg2[%c0, %c0_0, %c0_1] : memref<1x4x256xf32, #tpu.memory_space<vmem>>, vector<1x4x256xf32>
    %1 = vector.shape_cast %0 : vector<1x4x256xf32> to vector<4x256xf32>
    %c0_2 = arith.constant 0 : index
    %c0_3 = arith.constant 0 : index
    %c0_4 = arith.constant 0 : index
    %2 = vector.load %arg3[%c0_2, %c0_3, %c0_4] : memref<2x4x4xf32, #tpu.memory_space<vmem>>, vector<1x4x4xf32>
    %3 = vector.shape_cast %2 : vector<1x4x4xf32> to vector<4x4xf32>
    %c0_5 = arith.constant 0 : index
    %c0_6 = arith.constant 0 : index
    %c0_7 = arith.constant 0 : index
    %4 = vector.load %arg4[%c0_5, %c0_6, %c0_7] : memref<2x4x1xf32, #tpu.memory_space<vmem>>, vector<1x4x1xf32>
    %5 = vector.shape_cast %4 : vector<1x4x1xf32> to vector<4x1xf32>
    %6 = vector.extract_strided_slice %1 {offsets = [0, 0], sizes = [1, 256], strides = [1, 1]} : vector<4x256xf32> to vector<1x256xf32>
    %7 = vector.extract_strided_slice %3 {offsets = [0, 0], sizes = [4, 1], strides = [1, 1]} : vector<4x4xf32> to vector<4x1xf32>
    %8 = vector.broadcast %6 : vector<1x256xf32> to vector<4x256xf32>
    %9 = vector.broadcast %7 : vector<4x1xf32> to vector<4x256xf32>
    %10 = arith.mulf %8, %9 : vector<4x256xf32>
    %11 = vector.extract_strided_slice %1 {offsets = [1, 0], sizes = [1, 256], strides = [1, 1]} : vector<4x256xf32> to vector<1x256xf32>
    %12 = vector.extract_strided_slice %3 {offsets = [0, 1], sizes = [4, 1], strides = [1, 1]} : vector<4x4xf32> to vector<4x1xf32>
    %13 = vector.broadcast %11 : vector<1x256xf32> to vector<4x256xf32>
    %14 = vector.broadcast %12 : vector<4x1xf32> to vector<4x256xf32>
    %15 = arith.mulf %13, %14 : vector<4x256xf32>
    %16 = arith.addf %10, %15 : vector<4x256xf32>
    %17 = vector.extract_strided_slice %1 {offsets = [2, 0], sizes = [1, 256], strides = [1, 1]} : vector<4x256xf32> to vector<1x256xf32>
    %18 = vector.extract_strided_slice %3 {offsets = [0, 2], sizes = [4, 1], strides = [1, 1]} : vector<4x4xf32> to vector<4x1xf32>
    %19 = vector.broadcast %17 : vector<1x256xf32> to vector<4x256xf32>
    %20 = vector.broadcast %18 : vector<4x1xf32> to vector<4x256xf32>
    %21 = arith.mulf %19, %20 : vector<4x256xf32>
    %22 = arith.addf %16, %21 : vector<4x256xf32>
    %23 = vector.extract_strided_slice %1 {offsets = [3, 0], sizes = [1, 256], strides = [1, 1]} : vector<4x256xf32> to vector<1x256xf32>
    %24 = vector.extract_strided_slice %3 {offsets = [0, 3], sizes = [4, 1], strides = [1, 1]} : vector<4x4xf32> to vector<4x1xf32>
    %25 = vector.broadcast %23 : vector<1x256xf32> to vector<4x256xf32>
    %26 = vector.broadcast %24 : vector<4x1xf32> to vector<4x256xf32>
    %27 = arith.mulf %25, %26 : vector<4x256xf32>
    %28 = arith.addf %22, %27 : vector<4x256xf32>
    %29 = vector.broadcast %5 : vector<4x1xf32> to vector<4x256xf32>
    %30 = arith.addf %28, %29 : vector<4x256xf32>
    %cst = arith.constant 0.000000e+00 : f32
    %31 = vector.broadcast %cst : f32 to vector<4x256xf32>
    %32 = arith.maximumf %30, %31 : vector<4x256xf32>
    %c1 = arith.constant 1 : index
    %c0_8 = arith.constant 0 : index
    %c0_9 = arith.constant 0 : index
    %33 = vector.load %arg3[%c1, %c0_8, %c0_9] : memref<2x4x4xf32, #tpu.memory_space<vmem>>, vector<1x4x4xf32>
    %34 = vector.shape_cast %33 : vector<1x4x4xf32> to vector<4x4xf32>
    %c1_10 = arith.constant 1 : index
    %c0_11 = arith.constant 0 : index
    %c0_12 = arith.constant 0 : index
    %35 = vector.load %arg4[%c1_10, %c0_11, %c0_12] : memref<2x4x1xf32, #tpu.memory_space<vmem>>, vector<1x4x1xf32>
    %36 = vector.shape_cast %35 : vector<1x4x1xf32> to vector<4x1xf32>
    %37 = vector.extract_strided_slice %32 {offsets = [0, 0], sizes = [1, 256], strides = [1, 1]} : vector<4x256xf32> to vector<1x256xf32>
    %38 = vector.extract_strided_slice %34 {offsets = [0, 0], sizes = [4, 1], strides = [1, 1]} : vector<4x4xf32> to vector<4x1xf32>
    %39 = vector.broadcast %37 : vector<1x256xf32> to vector<4x256xf32>
    %40 = vector.broadcast %38 : vector<4x1xf32> to vector<4x256xf32>
    %41 = arith.mulf %39, %40 : vector<4x256xf32>
    %42 = vector.extract_strided_slice %32 {offsets = [1, 0], sizes = [1, 256], strides = [1, 1]} : vector<4x256xf32> to vector<1x256xf32>
    %43 = vector.extract_strided_slice %34 {offsets = [0, 1], sizes = [4, 1], strides = [1, 1]} : vector<4x4xf32> to vector<4x1xf32>
    %44 = vector.broadcast %42 : vector<1x256xf32> to vector<4x256xf32>
    %45 = vector.broadcast %43 : vector<4x1xf32> to vector<4x256xf32>
    %46 = arith.mulf %44, %45 : vector<4x256xf32>
    %47 = arith.addf %41, %46 : vector<4x256xf32>
    %48 = vector.extract_strided_slice %32 {offsets = [2, 0], sizes = [1, 256], strides = [1, 1]} : vector<4x256xf32> to vector<1x256xf32>
    %49 = vector.extract_strided_slice %34 {offsets = [0, 2], sizes = [4, 1], strides = [1, 1]} : vector<4x4xf32> to vector<4x1xf32>
    %50 = vector.broadcast %48 : vector<1x256xf32> to vector<4x256xf32>
    %51 = vector.broadcast %49 : vector<4x1xf32> to vector<4x256xf32>
    %52 = arith.mulf %50, %51 : vector<4x256xf32>
    %53 = arith.addf %47, %52 : vector<4x256xf32>
    %54 = vector.extract_strided_slice %32 {offsets = [3, 0], sizes = [1, 256], strides = [1, 1]} : vector<4x256xf32> to vector<1x256xf32>
    %55 = vector.extract_strided_slice %34 {offsets = [0, 3], sizes = [4, 1], strides = [1, 1]} : vector<4x4xf32> to vector<4x1xf32>
    %56 = vector.broadcast %54 : vector<1x256xf32> to vector<4x256xf32>
    %57 = vector.broadcast %55 : vector<4x1xf32> to vector<4x256xf32>
    %58 = arith.mulf %56, %57 : vector<4x256xf32>
    %59 = arith.addf %53, %58 : vector<4x256xf32>
    %60 = vector.broadcast %36 : vector<4x1xf32> to vector<4x256xf32>
    %61 = arith.addf %59, %60 : vector<4x256xf32>
    %cst_13 = arith.constant 0.000000e+00 : f32
    %62 = vector.broadcast %cst_13 : f32 to vector<4x256xf32>
    %63 = arith.maximumf %61, %62 : vector<4x256xf32>
    %c0_14 = arith.constant 0 : index
    %c0_15 = arith.constant 0 : index
    %c0_16 = arith.constant 0 : index
    %64 = vector.load %arg5[%c0_14, %c0_15, %c0_16] : memref<1x4x256xf32, #tpu.memory_space<vmem>>, vector<1x4x256xf32>
    %65 = vector.shape_cast %64 : vector<1x4x256xf32> to vector<4x256xf32>
    %66 = vector.shape_cast %63 : vector<4x256xf32> to vector<1x4x256xf32>
    tpu.vector_store %arg5[%c0_14, %c0_15, %c0_16], %66 {strides = array<i32>} : memref<1x4x256xf32, #tpu.memory_space<vmem>>, vector<1x4x256xf32>,
    return
  }
  func.func @transform_0(%arg0: i32, %arg1: i32) -> (i32, i32, i32) {
    %c0_i32 = arith.constant 0 : i32
    %c0_i32_0 = arith.constant 0 : i32
    return %arg0, %c0_i32, %arg1 : i32, i32, i32
  }
  func.func @transform_1(%arg0: i32, %arg1: i32) -> (i32, i32, i32) {
    %c0_i32 = arith.constant 0 : i32
    %c0_i32_0 = arith.constant 0 : i32
    %c0_i32_1 = arith.constant 0 : i32
    %c0_i32_2 = arith.constant 0 : i32
    return %c0_i32, %c0_i32_0, %c0_i32_1 : i32, i32, i32
  }
  func.func @transform_2(%arg0: i32, %arg1: i32) -> (i32, i32, i32) {
    %c0_i32 = arith.constant 0 : i32
    %c0_i32_0 = arith.constant 0 : i32
    %c0_i32_1 = arith.constant 0 : i32
    %c0_i32_2 = arith.constant 0 : i32
    return %c0_i32, %c0_i32_0, %c0_i32_1 : i32, i32, i32
  }
  func.func @transform_3(%arg0: i32, %arg1: i32) -> (i32, i32, i32) {
    %c0_i32 = arith.constant 0 : i32
    %c0_i32_0 = arith.constant 0 : i32
    return %arg0, %c0_i32, %arg1 : i32, i32, i32
  }
}

</mosaic_0001>

<bundles_post_ra>
// kernel: tpu_custom_call.1
= control target key start
LH: loop header
LB: loop body
LE: loop exit
PB: predicated region body
PF: predicated region fallthrough
CT: control target
= control target key end

     0   :  { %8 = vsyncpa [#allocation3], 0  ;;  %s937_s0 = inlined_call_operand.hbm [shape: f32[4,4,256], index: 0, kind: input, shape index: {}]   ;;  %s938_s1 = inlined_call_operand.vmem [shape: f32[2,4,4], index: 1, kind: input, shape index: {}]   ;;  %s939_s2 = inlined_call_operand.vmem [shape: f32[2,4,1], index: 2, kind: input, shape index: {}]   ;;  %s940_s3 = inlined_call_operand.hbm [shape: f32[4,4,256], index: 3, kind: output, shape index: {}]  }
   0x1   :  { %10 = vsyncpa [#allocation3 + $0x1], 0 }
   0x2   :  { %11 = vsyncpa [#allocation4], 0 }
   0x3   :  { %13 = vsyncpa [#allocation4 + $0x1], 0  ;;  %s741_s12 = smov 0   ;;  %s743_s13 = smov 0  }
   0x4   :  { %s745_s14 = smov 0   ;;  %s747_s15 = smov 0  }
   0x5   :  { %s749_s16 = smov 0   ;;  %s751_s17 = smov 0  }
   0x6 LB: > { %s505_s18 = sadd.s32 4294967295, %s713_s17   ;;  %s506_s19 = sadd.s32 4294967294, %s713_s17   ;;  %s713_s17 = sphi %s751_s17, %s19_s17   ;;  %s709_s16 = sphi %s749_s16, %s955_s16   ;;  %s705_s15 = sphi %s747_s15, %s954_s15   ;;  %s701_s14 = sphi %s745_s14, %s953_s14   ;;  %s697_s13 = sphi %s743_s13, %s952_s13   ;;  %s693_s12 = sphi %s741_s12, %s951_s12  }
   0x7   : > { %s31_s20 = sadd.s32 1, %s709_s16  ;;  %s40_s21 = sadd.s32 1, %s701_s14 }
   0x8   : > { %p33_p0 = scmp.ge.s32.totalorder %s31_s20, 4  ;;  %p47_p1 = scmp.ne.s32.totalorder %s701_s14, %s697_s13 }
   0x9   : > { %p48_p2 = scmp.eq.s32.totalorder %s713_s17, 0  ;;  %p53_p3 = scmp.ne.s32.totalorder %s697_s13, %s693_s12 }
   0xa   : > { %s957_s20 = smov (%p33_p0, %s31_s20), 0  ;;  %p54_p5 = scmp.eq.s32.totalorder %s505_s18, 0 }
   0xb   : > { %p782_p4 = por %p48_p2, %p47_p1  ;;  %s35_s23 = ssub.s32 %s709_s16, %s957_s20 }
   0xc   : > { %p121_p6 = scmp.eq.s32.totalorder %s505_s18, 3  ;;  %p38_p7 = scmp.eq.s32.totalorder %s35_s23, 0 }
   0xd   : > { %p788_p8 = por %p54_p5, %p53_p3  ;;  %p127_p10 = scmp.eq.s32.totalorder %s506_s19, 3 }
   0xe   : > { %p792_p9 = por %p121_p6, %p47_p1  ;;  %p536_p12 = scmp.lt.s32.totalorder %s713_s17, 4 }
   0xf   : > { %s797_s26 = scalar_select %p38_p7, %s701_s14, %s40_s21  }
  0x10   : > { %s944_s25 = scalar_select %p792_p9, 1, 0 }
  0x11   : > { %p799_p11 = por %p127_p10, %p53_p3  ;;  %s153_s28 = sand.u32 1, %s701_s14  }
  0x12   : > { %s509_s29 = sshll.u32 %s153_s28, 3  ;;  %s522_s30 = sshll.u32 %s709_s16, 7 }
  0x13   : > { %s945_s27 = scalar_select %p799_p11, 1, 0 }
  0x14   : > { %s809_s6 = scalar_lea.hbm %s937_s0, %s522_s30  ;;  %s157_s7 = scalar_lea.vmem [#allocation2], %s509_s29 }
  0x15   : > { %s167_s8 = sshll.u32 %s157_s7, 4  ;;  %p815_p13 = pnand %p536_p12, %p782_p4  ;;  %s811_s8 = int_to_ptr.vmem [resolvable:$true] %s167_s8 }
  0x16   : > { %s154_s10 = scalar_lea.sflag [#allocation3], %s153_s28  ;;  %s601_s11 = scalar_lea.hbm %s809_s6, 128 }
  0x17   : > { %p602_p2 = scmp.ne.s32.totalorder %s809_s6, %s601_s11  ;;  %p603_p3 = pneg %p815_p13 }
  0x18   : > { %s606_s21 = scalar_lea.hbm %s937_s0, 512  ;;  %p607_p4 = scmp.lt.u32.totalorder %s809_s6, %s937_s0 }
  0x19   : > { %p604_p5 = pnand %p603_p3, %p602_p2  ;;  %p608_p7 = scmp.lt.u32.totalorder %s606_s21, %s601_s11 }
  0x1a   : > { %p610_p12 = scmp.lt.u32.totalorder %s601_s11, %s809_s6 }
  0x1b   : > { %p605_p6 = pneg %p604_p5  ;;  %p609_p10 = por %p608_p7, %p607_p4 }
  0x1d   : > { %p611_p0 = por %p610_p12, %p609_p10 }
  0x1f   : > { %p612_p1 = pnand %p611_p0, %p605_p6 }
  0x21   : > { %615 = shalt.err (!%p612_p1)
}
  0x22   : > { %s616_s28 = scalar_lea.vmem %s811_s8, 128  ;;  %s715_s29 = smov [#allocation2]  }
  0x23   : > { %p617_p2 = scmp.ne.s32.totalorder %s811_s8, %s616_s28  ;;  %s621_s30 = sshll.u32 %s715_s29, 4  ;;  %s622_s30 = int_to_ptr.vmem [resolvable:$false] %s621_s30 }
  0x24   : > { %s623_s4 = scalar_lea.vmem %s622_s30, 256  ;;  %p624_p9 = scmp.lt.s32.totalorder %s811_s8, %s622_s30 }
  0x25   : > { %p619_p5 = pnand %p617_p2, %p603_p3  ;;  %p625_p4 = scmp.lt.s32.totalorder %s623_s4, %s616_s28 }
  0x27   : > { %p620_p11 = pneg %p619_p5  ;;  %p626_p7 = por %p625_p4, %p624_p9 }
  0x29   : > { %p627_p10 = pnand %p626_p7, %p620_p11 }
  0x2b   : > { %630 = shalt.err (!%p627_p10)
}
  0x2c   : > { %531 = dma.hbm_to_vmem [thread:$0]  (!%p815_p13), %s809_s6, 128, %s811_s8, %s154_s10  }
  0x2d   : > { %p947_p0 = scmp.lt.s32.totalorder %s713_s17, 5  ;;  %p948_p1 = scmp.ge.s32.totalorder %s713_s17, 1 }
  0x2f   : > { %p173_p3 = pnand %p948_p1, %p947_p0 }
  0x30   : > { %s851_s5 = sand.u32 (!%p173_p3), 1, %s697_s13  }
  0x31   : > { %176 = sbr.rel (%p173_p3) target bundleno = 234 (0xea), region = 32  ;;  %s513_s7 = sshll.u32 (!%p173_p3), %s851_s5, 3 }
  0x32   : > { %s179_s11 = scalar_lea.sflag (!%p173_p3), [#allocation3], %s851_s5  ;;  %s857_s9 = scalar_lea.vmem (!%p173_p3), [#allocation2], %s513_s7 }
  0x38   : > { %684 = dma.done.wait (%p788_p8), %s179_s11, 128  }
  0x39   : > { %686 = vsyncadd (%p788_p8), %s179_s11, 4294967168  ;;  %v716_v0 = vmov 2   ;;  %v717_v1 = vmov 0   ;;  %v208_v2 = vld [vmem:[%s938_s1] sm:$0xf]  ;;  %v718_v3 = vmov 3   ;;  %v211_v8 = vlaneseq }
  0x3a   : > { %592 = vset.pattern.permute.xlu1 %v716_v0  ;;  %590 = vset.pattern.permute.xlu0 %v717_v1  ;;  %v719_v4 = vmov 1   ;;  %v209_v5 = vld [vmem:[%s939_s2] sm:$0xf]  ;;  %v515_v6 = vld [vmem:[%s938_s1 + $0x4] sm:$0xf]  ;;  %s523_s23 = sshll.u32 %s705_s15, 7 }
  0x3b   : > { %281 = vperm.xlu1 %592, %v208_v2   ;;  %231 = vperm.xlu0 %590, %v208_v2   ;;  %v516_v7 = vld [vmem:[%s939_s2 + $0x4] sm:$0xf]  ;;  %v212_v9 = vshrl.u32 %v211_v8, 7  ;;  %s204_s28 = scalar_lea.vmem [#allocation5], %s513_s7  ;;  %s889_s11 = scalar_lea.hbm %s940_s3, %s523_s23 }
  0x3c   : > { %v207_v14 = vld [vmem:[%s857_s9] sm:$0xff]  ;;  %s421_s29 = sshll.u32 %s204_s28, 4  ;;  %s405_s9 = scalar_lea.sflag [#allocation4], %s851_s5  ;;  %s891_s29 = int_to_ptr.vmem [resolvable:$true] %s421_s29 }
  0x3d   : > { %v213_v10 = vsub.s32 0, %v212_v9  ;;  %v217_v11 = vsub.s32 4, %v212_v9  ;;  %v238_v12 = vsub.s32 1, %v212_v9  ;;  %v242_v13 = vsub.s32 5, %v212_v9  ;;  %s631_s6 = scalar_lea.vmem %s891_s29, 128  ;;  %p949_p9 = scmp.ne.s32.totalorder %s944_s25, 0 }
  0x3e   : > { %v264_v15 = vsub.s32 2, %v212_v9  ;;  %v268_v16 = vsub.s32 6, %v212_v9  ;;  %v876_v17 = vsub.s32 3, %v212_v9  ;;  %v294_v18 = vsub.s32 7, %v212_v9  ;;  %p632_p8 = scmp.ne.s32.totalorder %s891_s29, %s631_s6  ;;  %s720_s15 = smov [#allocation5]  }
  0x3f   : > { %593 = vset.pattern.permute.xlu1 %v718_v3  ;;  %591 = vset.pattern.permute.xlu0 %v719_v4  ;;  %v214_v19 = vrot.slane %v207_v14, %v213_v10  ;;  %v218_v20 = vrot.slane %v207_v14, %v217_v11  ;;  %v239_v21 = vrot.slane %v207_v14, %v238_v12  ;;  %s635_s7 = sshll.u32 %s720_s15, 4  ;;  %s636_s7 = int_to_ptr.vmem [resolvable:$false] %s635_s7 }
  0x40   : > { %307 = vperm.xlu1 %593, %v208_v2   ;;  %255 = vperm.xlu0 %591, %v208_v2   ;;  %v243_v22 = vrot.slane %v207_v14, %v242_v13  ;;  %v265_v25 = vrot.slane %v207_v14, %v264_v15  ;;  %v269_v26 = vrot.slane %v207_v14, %v268_v16  ;;  %p633_p11 = pnand %p632_p8, %p949_p9  ;;  %s637_s8 = scalar_lea.vmem %s636_s7, 256 }
  0x41   : > { %v291_v27 = vrot.slane %v207_v14, %v876_v17  ;;  %v295_v28 = vrot.slane %v207_v14, %v294_v18  ;;  %v224_v29 = vrot.slane %v214_v19, %v213_v10  ;;  %v228_v30 = vrot.slane %v218_v20, %v213_v10  ;;  %p638_p6 = scmp.lt.s32.totalorder %s891_s29, %s636_s7  ;;  %p639_p12 = scmp.lt.s32.totalorder %s637_s8, %s631_s6 }
  0x42   : > { %v249_v31 = vrot.slane %v239_v21, %v238_v12  ;;  %v253_v32 = vrot.slane %v243_v22, %v238_v12  ;;  %v275_v33 = vrot.slane %v265_v25, %v264_v15  ;;  %v279_v34 = vrot.slane %v269_v26, %v264_v15  ;;  %p634_p13 = pneg %p633_p11 }
  0x43   : > { %v301_v37 = vrot.slane %v291_v27, %v876_v17  ;;  %v305_v38 = vrot.slane %v295_v28, %v876_v17  ;;  %p640_p2 = por %p639_p12, %p638_p6 }
  0x44   : > { %594 = vset.pattern.permute.xlu1 %v717_v1  ;;  %595 = vset.pattern.permute.xlu0 %v717_v1 }
  0x45   : > { %316 = vperm.xlu1 %594, %v209_v5   ;;  %337 = vperm.xlu0 %595, %v515_v6   ;;  %p641_p5 = pnand %p640_p2, %p634_p13 }
  0x49   : > { %596 = vset.pattern.permute.xlu1 %v719_v4  ;;  %598 = vset.pattern.permute.xlu0 %v718_v3 }
  0x4a   : > { %351 = vperm.xlu1 %596, %v515_v6   ;;  %383 = vperm.xlu0 %598, %v515_v6  }
  0x4e   : > { %597 = vset.pattern.permute.xlu1 %v716_v0  ;;  %600 = vset.pattern.permute.xlu0 %v717_v1 }
  0x4f   : > { %367 = vperm.xlu1 %597, %v515_v6  }
  0x53   : > { %599 = vset.pattern.permute.xlu1 %v717_v1 }
  0x54   : > { %392 = vperm.xlu1 %599, %v516_v7  }
  0xba   : > { %v232_v23 = vpop.permute.xlu0 %231  ;;  %v282_v24 = vpop.permute.xlu1 %281 }
  0xbb   : > { %v234_v39 = vmul.f32 %v232_v23, %v224_v29  ;;  %v235_v40 = vmul.f32 %v232_v23, %v228_v30  ;;  %v284_v43 = vmul.f32 %v282_v24, %v275_v33  ;;  %v285_v44 = vmul.f32 %v282_v24, %v279_v34 }
  0xbf   : > { %v256_v35 = vpop.permute.xlu0 %255  ;;  %v308_v36 = vpop.permute.xlu1 %307 }
  0xc0   : > { %v258_v41 = vmul.f32 %v256_v35, %v249_v31  ;;  %v259_v42 = vmul.f32 %v256_v35, %v253_v32  ;;  %v310_v47 = vmul.f32 %v308_v36, %v301_v37  ;;  %v311_v48 = vmul.f32 %v308_v36, %v305_v38 }
  0xc2   : > { %v260_v45 = vadd.f32 %v258_v41, %v234_v39  ;;  %v261_v46 = vadd.f32 %v259_v42, %v235_v40 }
  0xc4   : > { %v317_v49 = vpop.permute.xlu1 %316  ;;  %v286_v50 = vadd.f32 %v284_v43, %v260_v45  ;;  %v287_v51 = vadd.f32 %v285_v44, %v261_v46  ;;  %v338_v56 = vpop.permute.xlu0 %337 }
  0xc6   : > { %v312_v52 = vadd.f32 %v310_v47, %v286_v50  ;;  %v313_v53 = vadd.f32 %v311_v48, %v287_v51 }
  0xc8   : > { %v319_v54 = vadd.f32 %v317_v49, %v312_v52  ;;  %v320_v55 = vadd.f32 %v317_v49, %v313_v53 }
  0xc9   : > { %v352_v57 = vpop.permute.xlu1 %351  ;;  %v384_v9 = vpop.permute.xlu0 %383 }
  0xca   : > { %v321_v58 = vmax.f32 %v319_v54, 0.0  ;;  %v322_v59 = vmax.f32 %v320_v55, 0.0 }
  0xcc   : > { %v330_v60 = vrot.slane %v321_v58, %v213_v10  ;;  %v334_v61 = vrot.slane %v322_v59, %v213_v10  ;;  %v345_v62 = vrot.slane %v321_v58, %v238_v12  ;;  %v349_v63 = vrot.slane %v322_v59, %v238_v12 }
  0xcd   : > { %v377_v0 = vrot.slane %v321_v58, %v876_v17  ;;  %v381_v1 = vrot.slane %v322_v59, %v876_v17  ;;  %v361_v2 = vrot.slane %v321_v58, %v264_v15  ;;  %v365_v3 = vrot.slane %v322_v59, %v264_v15 }
  0xce   : > { %v340_v4 = vmul.f32 %v338_v56, %v330_v60  ;;  %v341_v5 = vmul.f32 %v338_v56, %v334_v61  ;;  %v354_v6 = vmul.f32 %v352_v57, %v345_v62  ;;  %v355_v7 = vmul.f32 %v352_v57, %v349_v63  ;;  %v368_v8 = vpop.permute.xlu1 %367 }
  0xcf   : > { %v370_v11 = vmul.f32 %v368_v8, %v361_v2  ;;  %v371_v13 = vmul.f32 %v368_v8, %v365_v3  ;;  %v386_v16 = vmul.f32 %v384_v9, %v377_v0  ;;  %v387_v12 = vmul.f32 %v384_v9, %v381_v1 }
  0xd0   : > { %v356_v14 = vadd.f32 %v354_v6, %v340_v4  ;;  %v357_v10 = vadd.f32 %v355_v7, %v341_v5 }
  0xd2   : > { %v372_v18 = vadd.f32 %v370_v11, %v356_v14  ;;  %v373_v19 = vadd.f32 %v371_v13, %v357_v10 }
  0xd3   : > { %v393_v17 = vpop.permute.xlu1 %392 }
  0xd4   : > { %v388_v20 = vadd.f32 %v386_v16, %v372_v18  ;;  %v389_v15 = vadd.f32 %v387_v12, %v373_v19 }
  0xd6   : > { %v395_v21 = vadd.f32 %v393_v17, %v388_v20  ;;  %v396_v22 = vadd.f32 %v393_v17, %v389_v15 }
  0xd8   : > { %v397_v23 = vmax.f32 %v395_v21, 0.0  ;;  %v398_v24 = vmax.f32 %v396_v22, 0.0 }
  0xda   : > { %v401_v25 = vcombine.low %v397_v23, %v398_v24 }
  0xdc   : > { %403 = vst [vmem:[%s204_s28] sm:$0xff] %v401_v25 }
  0xdd   : > { %644 = shalt.err (!%p641_p5)
}
  0xde   : > { %s645_s5 = scalar_lea.hbm %s889_s11, 128  ;;  %s649_s24 = scalar_lea.hbm %s940_s3, 512 }
  0xdf   : > { %p646_p4 = scmp.ne.s32.totalorder %s889_s11, %s645_s5  ;;  %p650_p0 = scmp.lt.u32.totalorder %s889_s11, %s940_s3 }
  0xe0   : > { %p651_p1 = scmp.lt.u32.totalorder %s649_s24, %s645_s5  ;;  %p653_p8 = scmp.lt.u32.totalorder %s645_s5, %s889_s11 }
  0xe1   : > { %p647_p7 = pnand %p646_p4, %p949_p9 }
  0xe2   : > { %p652_p3 = por %p651_p1, %p650_p0 }
  0xe3   : > { %p648_p10 = pneg %p647_p7 }
  0xe4   : > { %p654_p11 = por %p653_p8, %p652_p3 }
  0xe6   : > { %p655_p13 = pnand %p654_p11, %p648_p10 }
  0xe8   : > { %658 = shalt.err (!%p655_p13)
}
  0xe9   : > { %526 = dma.vmem_to_hbm [thread:$0]  (%p949_p9), %s891_s29, 128, %s889_s11, %s405_s9  }
  0xea PF: > { %p537_p6 = scmp.ge.s32.totalorder %s713_s17, 2  ;;  %s433_s22 = sand.u32 1, %s693_s12  }
  0xeb   : > { %p950_p12 = scmp.ne.s32.totalorder %s945_s27, 0  ;;  %s434_s23 = scalar_lea.sflag [#allocation4], %s433_s22 }
  0xed   : > { %p533_p2 = pnand %p537_p6, %p950_p12 }
  0xef   : > { %688 = dma.done.wait (!%p533_p2), %s434_s23, 128  }
  0xf0   : > { %690 = vsyncadd (!%p533_p2), %s434_s23, 4294967168  ;;  %s19_s17 = sadd.s32 1, %s713_s17   ;;  %s951_s12 = smov %s697_s13 }
  0xf1   : > { %p16_p5 = scmp.ge.s32.totalorder %s19_s17, 6   ;;  %s952_s13 = smov %s701_s14 }
  0xf2   : > { %s953_s14 = smov %s797_s26  ;;  %s954_s15 = smov %s709_s16 }
  0xf3   : > { %s955_s16 = smov %s957_s20  ;;  %18 = sbr.rel (!%p16_p5) target bundleno = 6 (0x6), region = 79 }
  0xfa   :  { %439 = vsyncpa [#allocation3], 1 }
  0xfb   :  { %441 = vsyncpa [#allocation3 + $0x1], 1 }
  0xfc   :  { %442 = vsyncpa [#allocation4], 1 }
  0xfd   :  { %444 = vsyncpa [#allocation4 + $0x1], 1 }

</bundles_post_ra>
